<compile_context>
chip_gen: v5e
topology: v5e:2x2
jax: 0.10.0
libtpu: 0.0.40
codegen_flags: <defaults>
</compile_context>

<pallas_src>
import functools
from itertools import product

import numpy as np
import jax
import jax.numpy as jnp
from jax.experimental import pallas as pl
from jax.experimental.pallas import tpu as pltpu

_LANE = 128     # last dims padded to a multiple of the 128-wide lane axis
_SUBLANE = 8    # f32 sublane count: batch tiles padded to a multiple of this


def _round_up(n, m):
    return ((n + m - 1) // m) * m


# ----------------------------- tree helpers (plain Python, same as PyTorch) -----------------------------
def _get_leaves_nodes(nodes):
    parents = set()
    children = set()
    for node in nodes:
        parents.add(node)
        children.update(nodes[node])
    children.add(0)
    leaves = list(sorted(children - parents))
    all_nodes = children | parents
    return leaves, all_nodes


def _get_nodes_to_all_ancestors(nodes, root=1, ancestors=None):
    if ancestors is None:
        ancestors = {0: set()}
    if root not in ancestors:
        ancestors[root] = set()
    if root in nodes:
        for child in nodes[root]:
            if child not in ancestors:
                ancestors[child] = set()
            ancestors[child].update(ancestors[root])
            ancestors[child].add(root)
            _get_nodes_to_all_ancestors(nodes, root=child, ancestors=ancestors)
    return ancestors


def _get_nodes_to_leaves(nodes, root=1, mapping=None):
    if mapping is None:
        mapping = {0: [0]}
    mapping[root] = []
    if root in nodes:
        for child in nodes[root]:
            _get_nodes_to_leaves(nodes, root=child, mapping=mapping)
            mapping[root].extend(mapping[child])
    else:
        mapping[root].append(root)
    return mapping


# ----------------------------- deterministic parameter construction (mirrors _init_weights) -----------------------------
def build_matrix_lca_params(tree):
    leaves_list, nodes_set = _get_leaves_nodes(tree)
    leaves = {leaf: i for i, leaf in enumerate(leaves_list)}
    n_leaves = len(leaves)
    n_nodes = len(nodes_set)

    W1 = np.zeros((n_nodes, n_leaves), np.float32)   # leaves_to_ancestors.weight
    b1 = -10.0 * np.ones((n_nodes,), np.float32)     # leaves_to_ancestors.bias
    W2 = np.zeros((n_nodes, n_nodes), np.float32)    # children_to_parents.weight
    b2 = -20.0 * np.ones((n_nodes,), np.float32)     # children_to_parents.bias
    W3 = np.zeros((n_nodes, n_nodes), np.float32)    # nodes_to_ancestors.weight
    b3 = -10.0 * np.ones((n_nodes,), np.float32)     # nodes_to_ancestors.bias

    node_leaf_mapping = _get_nodes_to_leaves(tree)
    for node, tips in node_leaf_mapping.items():
        for leaf in tips:
            W1[node, leaves[leaf]] = 15.0
            b1[leaf] = -10.0

    for node, children in tree.items():
        for child in children:
            W2[node, child] = 15.0

    for leaf1, leaf2 in product(leaves.keys(), leaves.keys()):
        if leaf1 == leaf2:
            W2[leaf1, leaf1] = 15.0
            b2[leaf1] = -5.0

    node_ancestor_mapping = _get_nodes_to_all_ancestors(tree)
    for node in node_ancestor_mapping:
        if node == 0:
            b3[0] = 10.0
            W3[0, 1:] = -20.0
        else:
            W3[node, node] = 20.0
        for ancestor in node_ancestor_mapping[node]:
            W3[node, ancestor] = -30.0

    b2[0] = 5.0
    for node in nodes_set:
        W2[node, 0] = -15.0

    params = dict(W1=W1, b1=b1, W2=W2, b2=b2, W3=W3, b3=b3)
    return params, n_leaves, n_nodes


# ----------------------------- one-time host-side parameter preparation -----------------------------
def prepare_matrix_lca_params(params, *, weight_dtype=jnp.bfloat16):
    """Transpose, fold, lane-pad and quantize the parameters (done once).

    Algebra of the fold:
        (0.5*(tanh(z)+1)) @ Wt + b == tanh(z) @ (0.5*Wt) + (b + 0.5*sum(Wt, axis=0))
        X[:, 0] = 0 before X @ W1t == zeroing row 0 of W1t.

    The leaf / node axes are zero-padded to multiples of 128 lanes; weights are
    cast to bf16 (MXU-native), biases stay f32 and are merged with the row-max
    mask into a single (8, n_nodes_pad) f32 constant slab:
        row 0: additive mask (float32.min on column 0 and on padded leaf lanes)
        row 1..3: folded biases of the three layers.
    """
    W1 = np.asarray(params["W1"], np.float32)   # (n_nodes, n_leaves)
    b1 = np.asarray(params["b1"], np.float32)
    W2 = np.asarray(params["W2"], np.float32)
    b2 = np.asarray(params["b2"], np.float32)
    W3 = np.asarray(params["W3"], np.float32)
    b3 = np.asarray(params["b3"], np.float32)

    n_nodes, n_leaves = W1.shape
    l_pad = _round_up(n_leaves, _LANE)
    n_pad = _round_up(n_nodes, _LANE)

    w1t = W1.T.copy()            # (n_leaves, n_nodes)
    w1t[0, :] = 0.0              # fold X[:, 0] = 0
    w2t = W2.T.copy()            # (n_nodes, n_nodes)
    w3t = W3.T.copy()

    b1f = b1 + 0.5 * w1t.sum(axis=0)
    b2f = b2 + 0.5 * w2t.sum(axis=0)
    b3f = b3 + 0.5 * w3t.sum(axis=0)

    w1p = np.zeros((l_pad, n_pad), np.float32)
    w1p[:n_leaves, :n_nodes] = 0.5 * w1t
    w2p = np.zeros((n_pad, n_pad), np.float32)
    w2p[:n_nodes, :n_nodes] = 0.5 * w2t
    w3p = np.zeros((n_pad, n_pad), np.float32)
    w3p[:n_nodes, :n_nodes] = 0.5 * w3t

    neg = np.finfo(np.float32).min
    consts = np.zeros((_SUBLANE, n_pad), np.float32)
    consts[0, 0] = neg                     # exclude column 0 from the row max
    consts[0, n_leaves:] = neg             # exclude zero-padded leaf lanes too
    consts[1, :n_nodes] = b1f
    consts[2, :n_nodes] = b2f
    consts[3, :n_nodes] = b3f

    return dict(
        w1=jnp.asarray(w1p, weight_dtype),   # (l_pad, n_pad)   bf16
        w2=jnp.asarray(w2p, weight_dtype),   # (n_pad, n_pad)   bf16
        w3=jnp.asarray(w3p, weight_dtype),   # (n_pad, n_pad)   bf16
        consts=jnp.asarray(consts),          # (8, n_pad)       f32
        n_leaves=n_leaves,
        n_nodes=n_nodes,
    )


# ----------------------------- Pallas kernel -----------------------------
def _lca_kernel(x_ref, w1_ref, w2_ref, w3_ref, consts_ref, o_ref, *,
                alpha, normalize, l_pad):
    x = x_ref[...]                                          # (tm, l_pad) f32

    if normalize:
        # Row max over real leaf columns 1..n_leaves-1; column 0 and the padded
        # leaf lanes are excluded via the resident additive mask (row 0).
        mask = consts_ref[0:1, :l_pad]                      # (1, l_pad), broadcasts
        row_max = jnp.max(x + mask, axis=1, keepdims=True)  # (tm, 1)
        norm = (1.0 - alpha) * row_max
        x = 100.0 * ((x - norm) * 5.0 * (1.0 / alpha) - 1.0)

    # Squashes / X[:,0]=0 folded into weights+biases, so each layer is:
    # f32 tanh (EUP) -> bf16 cast -> MXU matmul with f32 accumulation -> f32 bias.
    t0 = jnp.tanh(x).astype(w1_ref.dtype)
    z1 = jnp.dot(t0, w1_ref[...], preferred_element_type=jnp.float32) + consts_ref[1:2, :]
    t1 = jnp.tanh(z1).astype(w2_ref.dtype)
    z2 = jnp.dot(t1, w2_ref[...], preferred_element_type=jnp.float32) + consts_ref[2:3, :]
    t2 = jnp.tanh(z2).astype(w3_ref.dtype)
    z3 = jnp.dot(t2, w3_ref[...], preferred_element_type=jnp.float32) + consts_ref[3:4, :]

    o_ref[...] = z3.astype(o_ref.dtype)


@functools.partial(jax.jit, static_argnames=("n_leaves", "n_nodes", "alpha",
                                             "normalize", "block_rows", "out_dtype"))
def _matrix_lca_forward_impl(x, w1, w2, w3, consts, *, n_leaves, n_nodes,
                             alpha, normalize, block_rows, out_dtype):
    x = x.astype(jnp.float32)
    n, l = x.shape
    if l != n_leaves:
        raise ValueError(f"X expected to be of shape (N, {n_leaves}). Got (N, {l}).")
    l_pad, n_pad_nodes = w1.shape

    # Batch tiling: derive the row tile from the number of grid steps (padding
    # stays under one sublane group) and force >=2 steps so both v7x TensorCores
    # get work under dimension_semantics=("parallel",).
    steps = pl.cdiv(n, block_rows)
    steps = max(steps, 2)
    steps = min(steps, max(pl.cdiv(n, _SUBLANE), 1))
    tm = _round_up(pl.cdiv(n, steps), _SUBLANE)
    rows_pad = steps * tm

    if rows_pad != n or l_pad != l:
        x = jnp.pad(x, ((0, rows_pad - n), (0, l_pad - l)))

    # VMEM budget: single-buffered resident weights/consts + double-buffered
    # x / out tiles, with 2x headroom; capped at 48 MiB so the plan also fits
    # v7x's 64 MiB per-core VMEM (raise towards ~100 MiB on v5e/v6e for very
    # large taxonomies).
    out_itemsize = jnp.dtype(out_dtype).itemsize
    resident = (w1.size + w2.size + w3.size) * w1.dtype.itemsize + consts.size * 4
    streamed = 2 * tm * l_pad * 4 + 2 * tm * n_pad_nodes * out_itemsize
    vmem_limit = int(min(48 * 1024 * 1024,
                         max(32 * 1024 * 1024, 2 * (resident + streamed))))

    kernel = functools.partial(_lca_kernel, alpha=float(alpha),
                               normalize=bool(normalize), l_pad=int(l_pad))

    # Whole-array VMEM residency for weights / constants: one copy, no per-step
    # double buffer.  Only x and out are streamed (pipelined) over the grid.
    resident_spec = pl.BlockSpec(memory_space=pltpu.MemorySpace.VMEM)

    out = pl.pallas_call(
        kernel,
        out_shape=jax.ShapeDtypeStruct((rows_pad, n_pad_nodes), out_dtype),
        grid=(steps,),
        in_specs=[
            pl.BlockSpec((tm, l_pad), lambda i: (i, 0)),   # x tile (streamed)
            resident_spec,                                  # W1^T folded, bf16, lane-padded
            resident_spec,                                  # W2^T
            resident_spec,                                  # W3^T
            resident_spec,                                  # mask + folded biases (8, n_pad)
        ],
        out_specs=pl.BlockSpec((tm, n_pad_nodes), lambda i: (i, 0)),
        compiler_params=pltpu.CompilerParams(
            dimension_semantics=("parallel",),
            vmem_limit_bytes=vmem_limit),
    )(x, w1, w2, w3, consts)

    return out[:n, :n_nodes]


def matrix_lca_forward(x, prep, *, alpha=0.05, normalize=True, block_rows=1024,
                       out_dtype=jnp.float32):
    # NOTE: for taxonomies where bf16 W2+W3 exceed ~40 MiB (n_nodes >~ 3-4K), add a
    # grid axis over the node dimension (or stream W2/W3 tiles with
    # pltpu.emit_pipeline) instead of keeping both fully resident.  Downstream
    # consumers that tolerate it can pass out_dtype=jnp.bfloat16 to halve the
    # (N, n_nodes) HBM writeback.
    return _matrix_lca_forward_impl(
        x, prep["w1"], prep["w2"], prep["w3"], prep["consts"],
        n_leaves=int(prep["n_leaves"]), n_nodes=int(prep["n_nodes"]),
        alpha=float(alpha), normalize=bool(normalize),
        block_rows=int(block_rows), out_dtype=out_dtype)


# ----------------------------- pure-JAX references for sanity checks -----------------------------
def matrix_lca_reference(x, params, *, alpha=0.05, normalize=True):
    """f32 mirror of MatrixLCANet.forward (exact PyTorch semantics/order)."""
    x = jnp.asarray(x, jnp.float32)
    if normalize:
        row_max = jnp.max(x[:, 1:], axis=1, keepdims=True)
        norm = (1.0 - alpha) * row_max
        x = 100.0 * ((x - norm) * 5.0 * (1.0 / alpha) - 1.0)
    x = 0.5 * (jnp.tanh(x) + 1.0)
    x = x.at[:, 0].set(0.0)
    h = 0.5 * (jnp.tanh(x @ params["W1"].T + params["b1"]) + 1.0)
    h = 0.5 * (jnp.tanh(h @ params["W2"].T + params["b2"]) + 1.0)
    return h @ params["W3"].T + params["b3"]


def matrix_lca_folded_reference(x, params, *, alpha=0.05, normalize=True,
                                operand_dtype=jnp.float32):
    """Plain-JAX version of the folded math the kernel runs (optionally with the
    same bf16 operand casts).  Used to validate the Pallas kernel itself."""
    x = jnp.asarray(x, jnp.float32)
    w1t = jnp.asarray(params["W1"], jnp.float32).T
    w1t = w1t.at[0, :].set(0.0)
    w2t = jnp.asarray(params["W2"], jnp.float32).T
    w3t = jnp.asarray(params["W3"], jnp.float32).T
    b1 = jnp.asarray(params["b1"], jnp.float32) + 0.5 * jnp.sum(w1t, axis=0)
    b2 = jnp.asarray(params["b2"], jnp.float32) + 0.5 * jnp.sum(w2t, axis=0)
    b3 = jnp.asarray(params["b3"], jnp.float32) + 0.5 * jnp.sum(w3t, axis=0)
    w1q = (0.5 * w1t).astype(operand_dtype)
    w2q = (0.5 * w2t).astype(operand_dtype)
    w3q = (0.5 * w3t).astype(operand_dtype)

    if normalize:
        row_max = jnp.max(x[:, 1:], axis=1, keepdims=True)
        norm = (1.0 - alpha) * row_max
        x = 100.0 * ((x - norm) * 5.0 * (1.0 / alpha) - 1.0)

    t0 = jnp.tanh(x).astype(operand_dtype)
    z1 = jnp.dot(t0, w1q, preferred_element_type=jnp.float32) + b1
    t1 = jnp.tanh(z1).astype(operand_dtype)
    z2 = jnp.dot(t1, w2q, preferred_element_type=jnp.float32) + b2
    t2 = jnp.tanh(z2).astype(operand_dtype)
    return jnp.dot(t2, w3q, preferred_element_type=jnp.float32) + b3


if __name__ == "__main__":
    # Small taxonomy tree: node IDs 1..7, leaf 0 reserved for "unclassified".
    tree = {1: [2, 3], 2: [4, 5], 3: [6, 7]}
    params, n_leaves, n_nodes = build_matrix_lca_params(tree)   # n_leaves=5, n_nodes=8
    prep = prepare_matrix_lca_params(params)                    # fold + pad + bf16, done once

    key = jax.random.PRNGKey(0)
    N = 100   # not a tile multiple -> exercises padding and a 2-step grid
    x = jax.random.uniform(key, (N, n_leaves), dtype=jnp.float32)

    out = matrix_lca_forward(x, prep, alpha=0.05, normalize=True, block_rows=1024)
    out = jax.block_until_ready(out)

    # 1) The host-side fold is algebraically equivalent to the original math (f32 vs f32).
    ref_f32 = matrix_lca_reference(x, params, alpha=0.05, normalize=True)
    folded_f32 = matrix_lca_folded_reference(x, params, alpha=0.05, normalize=True,
                                             operand_dtype=jnp.float32)
    np.testing.assert_allclose(np.asarray(folded_f32), np.asarray(ref_f32),
                               rtol=1e-3, atol=1e-2)

    # 2) The Pallas kernel matches the same folded math with bf16 MXU operands.
    folded_bf16 = matrix_lca_folded_reference(x, params, alpha=0.05, normalize=True,
                                              operand_dtype=jnp.bfloat16)
    np.testing.assert_allclose(np.asarray(out), np.asarray(folded_bf16),
                               rtol=2e-2, atol=1e-1)

    print("KERNEL_OK")
</pallas_src>

<mosaic_0001>
module attributes {stable_mosaic.version = 11 : i64} {
  func.func @_lca_kernel(%arg0: i32, %arg1: memref<56x128xf32, #tpu.memory_space<vmem>>, %arg2: memref<128x128xbf16, #tpu.memory_space<vmem>>, %arg3: memref<128x128xbf16, #tpu.memory_space<vmem>>, %arg4: memref<128x128xbf16, #tpu.memory_space<vmem>>, %arg5: memref<8x128xf32, #tpu.memory_space<vmem>>, %arg6: memref<56x128xf32, #tpu.memory_space<vmem>>) attributes {dimension_semantics = [#tpu.dimension_semantics<parallel>], iteration_bounds = array<i64: 2>, scalar_prefetch = 0 : i64, scratch_operands = 0 : i64, tpu.core_type = #tpu.core_type<tc>, window_params = [{transform_indices = @transform_0, window_bounds = array<i64: 56, 128>}, {pipeline_mode = #tpu.pipeline_mode<synchronous>, transform_indices = @transform_1, window_bounds = array<i64: 128, 128>}, {pipeline_mode = #tpu.pipeline_mode<synchronous>, transform_indices = @transform_2, window_bounds = array<i64: 128, 128>}, {pipeline_mode = #tpu.pipeline_mode<synchronous>, transform_indices = @transform_3, window_bounds = array<i64: 128, 128>}, {pipeline_mode = #tpu.pipeline_mode<synchronous>, transform_indices = @transform_4, window_bounds = array<i64: 8, 128>}, {transform_indices = @transform_5, window_bounds = array<i64: 56, 128>}]} {
    %c0 = arith.constant 0 : index
    %c0_0 = arith.constant 0 : index
    %0 = vector.load %arg1[%c0, %c0_0] : memref<56x128xf32, #tpu.memory_space<vmem>>, vector<56x128xf32>
    %c0_1 = arith.constant 0 : index
    %c0_2 = arith.constant 0 : index
    %1 = vector.load %arg5[%c0_1, %c0_2] : memref<8x128xf32, #tpu.memory_space<vmem>>, vector<1x128xf32>
    %2 = vector.broadcast %1 : vector<1x128xf32> to vector<56x128xf32>
    %3 = arith.addf %0, %2 : vector<56x128xf32>
    %cst = arith.constant dense<0xFF800000> : vector<56xf32>
    %4 = vector.multi_reduction <maximumf>, %3, %cst [1] : vector<56x128xf32> to vector<56xf32>
    %5 = vector.shape_cast %4 : vector<56xf32> to vector<56x1xf32>
    %cst_3 = arith.constant 0.949999988 : f32
    %6 = vector.broadcast %cst_3 : f32 to vector<56x1xf32>
    %7 = arith.mulf %6, %5 : vector<56x1xf32>
    %8 = vector.broadcast %7 : vector<56x1xf32> to vector<56x128xf32>
    %9 = arith.subf %0, %8 : vector<56x128xf32>
    %cst_4 = arith.constant 5.000000e+00 : f32
    %10 = vector.broadcast %cst_4 : f32 to vector<56x128xf32>
    %11 = arith.mulf %9, %10 : vector<56x128xf32>
    %cst_5 = arith.constant 2.000000e+01 : f32
    %12 = vector.broadcast %cst_5 : f32 to vector<56x128xf32>
    %13 = arith.mulf %11, %12 : vector<56x128xf32>
    %cst_6 = arith.constant 1.000000e+00 : f32
    %14 = vector.broadcast %cst_6 : f32 to vector<56x128xf32>
    %15 = arith.subf %13, %14 : vector<56x128xf32>
    %cst_7 = arith.constant 1.000000e+02 : f32
    %16 = vector.broadcast %cst_7 : f32 to vector<56x128xf32>
    %17 = arith.mulf %16, %15 : vector<56x128xf32>
    %18 = math.tanh %17 : vector<56x128xf32>
    %19 = arith.truncf %18 : vector<56x128xf32> to vector<56x128xbf16>
    %c0_8 = arith.constant 0 : index
    %c0_9 = arith.constant 0 : index
    %20 = vector.load %arg2[%c0_8, %c0_9] : memref<128x128xbf16, #tpu.memory_space<vmem>>, vector<128x128xbf16>
    %cst_10 = arith.constant dense<0.000000e+00> : vector<56x128xf32>
    %21 = tpu.matmul %19, %20, %cst_10 {dimension_numbers = #tpu.dot_dimension_numbers<[1], [0], [0], [1], [0, 0, 1, 1], [], []>} : vector<56x128xbf16>, vector<128x128xbf16>, vector<56x128xf32> -> vector<56x128xf32>
    %c1 = arith.constant 1 : index
    %c0_11 = arith.constant 0 : index
    %22 = vector.load %arg5[%c1, %c0_11] : memref<8x128xf32, #tpu.memory_space<vmem>>, vector<1x128xf32>
    %23 = vector.broadcast %22 : vector<1x128xf32> to vector<56x128xf32>
    %24 = arith.addf %21, %23 : vector<56x128xf32>
    %25 = math.tanh %24 : vector<56x128xf32>
    %26 = arith.truncf %25 : vector<56x128xf32> to vector<56x128xbf16>
    %c0_12 = arith.constant 0 : index
    %c0_13 = arith.constant 0 : index
    %27 = vector.load %arg3[%c0_12, %c0_13] : memref<128x128xbf16, #tpu.memory_space<vmem>>, vector<128x128xbf16>
    %cst_14 = arith.constant dense<0.000000e+00> : vector<56x128xf32>
    %28 = tpu.matmul %26, %27, %cst_14 {dimension_numbers = #tpu.dot_dimension_numbers<[1], [0], [0], [1], [0, 0, 1, 1], [], []>} : vector<56x128xbf16>, vector<128x128xbf16>, vector<56x128xf32> -> vector<56x128xf32>
    %c2 = arith.constant 2 : index
    %c0_15 = arith.constant 0 : index
    %29 = vector.load %arg5[%c2, %c0_15] : memref<8x128xf32, #tpu.memory_space<vmem>>, vector<1x128xf32>
    %30 = vector.broadcast %29 : vector<1x128xf32> to vector<56x128xf32>
    %31 = arith.addf %28, %30 : vector<56x128xf32>
    %32 = math.tanh %31 : vector<56x128xf32>
    %33 = arith.truncf %32 : vector<56x128xf32> to vector<56x128xbf16>
    %c0_16 = arith.constant 0 : index
    %c0_17 = arith.constant 0 : index
    %34 = vector.load %arg4[%c0_16, %c0_17] : memref<128x128xbf16, #tpu.memory_space<vmem>>, vector<128x128xbf16>
    %cst_18 = arith.constant dense<0.000000e+00> : vector<56x128xf32>
    %35 = tpu.matmul %33, %34, %cst_18 {dimension_numbers = #tpu.dot_dimension_numbers<[1], [0], [0], [1], [0, 0, 1, 1], [], []>} : vector<56x128xbf16>, vector<128x128xbf16>, vector<56x128xf32> -> vector<56x128xf32>
    %c3 = arith.constant 3 : index
    %c0_19 = arith.constant 0 : index
    %36 = vector.load %arg5[%c3, %c0_19] : memref<8x128xf32, #tpu.memory_space<vmem>>, vector<1x128xf32>
    %37 = vector.broadcast %36 : vector<1x128xf32> to vector<56x128xf32>
    %38 = arith.addf %35, %37 : vector<56x128xf32>
    %c0_20 = arith.constant 0 : index
    %c0_21 = arith.constant 0 : index
    %39 = vector.load %arg6[%c0_20, %c0_21] : memref<56x128xf32, #tpu.memory_space<vmem>>, vector<56x128xf32>
    tpu.vector_store %arg6[%c0_20, %c0_21], %38 {strides = array<i32>} : memref<56x128xf32, #tpu.memory_space<vmem>>, vector<56x128xf32>,
    return
  }
  func.func @transform_0(%arg0: i32) -> (i32, i32) {
    %c0_i32 = arith.constant 0 : i32
    %c0_i32_0 = arith.constant 0 : i32
    return %arg0, %c0_i32 : i32, i32
  }
  func.func @transform_1(%arg0: i32) -> (i32, i32) {
    %c0_i32 = arith.constant 0 : i32
    %c0_i32_0 = arith.constant 0 : i32
    %c0_i32_1 = arith.constant 0 : i32
    return %c0_i32, %c0_i32_0 : i32, i32
  }
  func.func @transform_2(%arg0: i32) -> (i32, i32) {
    %c0_i32 = arith.constant 0 : i32
    %c0_i32_0 = arith.constant 0 : i32
    %c0_i32_1 = arith.constant 0 : i32
    return %c0_i32, %c0_i32_0 : i32, i32
  }
  func.func @transform_3(%arg0: i32) -> (i32, i32) {
    %c0_i32 = arith.constant 0 : i32
    %c0_i32_0 = arith.constant 0 : i32
    %c0_i32_1 = arith.constant 0 : i32
    return %c0_i32, %c0_i32_0 : i32, i32
  }
  func.func @transform_4(%arg0: i32) -> (i32, i32) {
    %c0_i32 = arith.constant 0 : i32
    %c0_i32_0 = arith.constant 0 : i32
    %c0_i32_1 = arith.constant 0 : i32
    return %c0_i32, %c0_i32_0 : i32, i32
  }
  func.func @transform_5(%arg0: i32) -> (i32, i32) {
    %c0_i32 = arith.constant 0 : i32
    %c0_i32_0 = arith.constant 0 : i32
    return %arg0, %c0_i32 : i32, i32
  }
}

</mosaic_0001>

<bundles_post_ra>
// kernel: _matrix_lca_forward_impl.1
= control target key start
LH: loop header
LB: loop body
LE: loop exit
PB: predicated region body
PF: predicated region fallthrough
CT: control target
= control target key end

     0   :  { %s914_s18 = smov 0   ;;  %s1034_s0 = inlined_call_operand.vmem [shape: f32[112,128], index: 0, kind: input, shape index: {}]   ;;  %s1035_s1 = inlined_call_operand.vmem [shape: bf16[128,128], index: 1, kind: input, shape index: {}]   ;;  %s1036_s2 = inlined_call_operand.vmem [shape: bf16[128,128], index: 2, kind: input, shape index: {}]   ;;  %s1037_s3 = inlined_call_operand.vmem [shape: bf16[128,128], index: 3, kind: input, shape index: {}]   ;;  %s1038_s4 = inlined_call_operand.vmem [shape: f32[8,128], index: 4, kind: input, shape index: {}]   ;;  %s1039_s5 = inlined_call_operand.vmem [shape: f32[112,128], index: 5, kind: output, shape index: {}]  }
   0x1 LB: > { %s678_s19 = sadd.s32 4294967295, %s882_s18   ;;  %p682_p0 = scmp.ge.s32.totalorder %s882_s18, 1  ;;  %s882_s18 = sphi %s914_s18, %s15_s18  }
   0x2   : > { %p188_p1 = scmp.lt.s32.totalorder %s882_s18, 3 }
   0x4   : > { %p189_p2 = pnand %p682_p0, %p188_p1 }
   0x5   : > { %s216_s20 = smul.u32 (!%p189_p2), 7, %s678_s19 }
   0x6   : > { %192 = sbr.rel (%p189_p2) target bundleno = 641 (0x281), region = 40 }
   0x7   : > { %p217_p3 = scmp.lt.s32.totalorder (!%p189_p2), %s216_s20, 13 }
   0xb   : > { %v797_v0 = vld [vmem:[%s1035_s1 + $0x38] sm:$0xff]  ;;  %s1041_s20 = smov (!%p217_p3, %s216_s20), 13  ;;  %v830_v1 = vld [vmem:[%s1038_s4] ss:$0 sm:$0xff]  ;;  %v796_v16 = vld [vmem:[%s1035_s1 + $0x30] sm:$0xff] }
   0xc   : > { %377 = vmatpush.bf16.msra.mxu0 %v797_v0  ;;  %814 = vmatpush.bf16.msra.mxu3 %v797_v0  ;;  %s683_s25 = sshll.u32 %s1041_s20, 3  ;;  %v795_v17 = vld [vmem:[%s1035_s1 + $0x28] sm:$0xff]  ;;  %v794_v18 = vld [vmem:[%s1035_s1 + $0x20] sm:$0xff]  ;;  %v793_v19 = vld [vmem:[%s1035_s1 + $0x18] sm:$0xff] }
   0xd   : > { %s220_s28 = scalar_lea.vmem %s1034_s0, %s683_s25  ;;  %v792_v20 = vld [vmem:[%s1035_s1 + $0x10] sm:$0xff]  ;;  %v791_v21 = vld [vmem:[%s1035_s1 + $0x8] sm:$0xff]  ;;  %v790_v22 = vld [vmem:[%s1035_s1] sm:$0xff]  ;;  %s226_s14 = scalar_lea.vmem %s1039_s5, %s683_s25 }
   0xe   : > { %v230_v2 = vld [vmem:[%s220_s28 + $0x10] sm:$0xff]  ;;  %v228_v3 = vld [vmem:[%s220_s28] sm:$0xff]  ;;  %v231_v8 = vld [vmem:[%s220_s28 + $0x18] sm:$0xff] }
   0xf   : > { %v239_v4 = vadd.f32 %v830_v1, %v230_v2  ;;  %v237_v5 = vadd.f32 %v830_v1, %v228_v3  ;;  %v936_v6 = vld [vmem:[%s220_s28 + $0x20] sm:$0xff]  ;;  %v229_v9 = vld [vmem:[%s220_s28 + $0x8] sm:$0xff]  ;;  %v240_v11 = vadd.f32 %v830_v1, %v231_v8  ;;  %v942_v14 = vld [vmem:[%s220_s28 + $0x30] sm:$0xff] }
  0x10   : > { %v241_v7 = vadd.f32 %v830_v1, %v936_v6  ;;  %v939_v10 = vld [vmem:[%s220_s28 + $0x28] sm:$0xff]  ;;  %v238_v12 = vadd.f32 %v830_v1, %v229_v9  ;;  %v243_v15 = vadd.f32 %v830_v1, %v942_v14  ;;  %378 = vmatpush.bf16.msra.mxu0 %v796_v16  ;;  %815 = vmatpush.bf16.msra.mxu3 %v796_v16 }
  0x11   : > { %248 = vmax.xlane.f32.xlu1 %v239_v4  ;;  %244 = vmax.xlane.f32.xlu0 %v237_v5  ;;  %v242_v13 = vadd.f32 %v830_v1, %v939_v10 }
  0x12   : > { %252 = vmax.xlane.f32.xlu2 %v241_v7 }
  0x14   : > { %379 = vmatpush.bf16.msra.mxu0 %v795_v17  ;;  %816 = vmatpush.bf16.msra.mxu3 %v795_v17 }
  0x18   : > { %380 = vmatpush.bf16.msra.mxu0 %v794_v18  ;;  %817 = vmatpush.bf16.msra.mxu3 %v794_v18 }
  0x19   : > { %250 = vmax.xlane.f32.xlu1 %v240_v11  ;;  %246 = vmax.xlane.f32.xlu0 %v238_v12  ;;  %v804_v11 = vld [vmem:[%s1036_s2 + $0x30] sm:$0xff] }
  0x1a   : > { %254 = vmax.xlane.f32.xlu2 %v242_v13  ;;  %v803_v13 = vld [vmem:[%s1036_s2 + $0x28] sm:$0xff] }
  0x1c   : > { %381 = vmatpush.bf16.msra.mxu0 %v793_v19  ;;  %818 = vmatpush.bf16.msra.mxu3 %v793_v19 }
  0x20   : > { %382 = vmatpush.bf16.msra.mxu0 %v792_v20  ;;  %819 = vmatpush.bf16.msra.mxu3 %v792_v20 }
  0x21   : > { %256 = vmax.xlane.f32.xlu0 %v243_v15 }
  0x24   : > { %383 = vmatpush.bf16.msra.mxu0 %v791_v21  ;;  %820 = vmatpush.bf16.msra.mxu3 %v791_v21 }
  0x28   : > { %384 = vmatpush.bf16.msra.mxu0 %v790_v22  ;;  %821 = vmatpush.bf16.msra.mxu3 %v790_v22  ;;  %v802_v22 = vld [vmem:[%s1036_s2 + $0x20] sm:$0xff] }
  0x84   : > { %v249_v23 = vpop.xlane.xlu1 %248  ;;  %v245_v24 = vpop.xlane.xlu0 %244 }
  0x85   : > { %v260_v25 = vmul.f32 0.95, %v249_v23  ;;  %v258_v26 = vmul.f32 0.95, %v245_v24  ;;  %v253_v27 = vpop.xlane.xlu2 %252  ;;  %v801_v23 = vld [vmem:[%s1036_s2 + $0x18] sm:$0xff]  ;;  %v800_v24 = vld [vmem:[%s1036_s2 + $0x10] sm:$0xff] }
  0x86   : > { %v262_v36 = vmul.f32 0.95, %v253_v27 }
  0x87   : > { %v267_v28 = vsub.f32 %v230_v2, %v260_v25  ;;  %v265_v29 = vsub.f32 %v228_v3, %v258_v26  ;;  %v799_v25 = vld [vmem:[%s1036_s2 + $0x8] sm:$0xff]  ;;  %v798_v26 = vld [vmem:[%s1036_s2] sm:$0xff] }
  0x88   : > { %v269_v45 = vsub.f32 %v936_v6, %v262_v36 }
  0x89   : > { %v274_v30 = vmul.f32 5.0, %v267_v28  ;;  %v272_v31 = vmul.f32 5.0, %v265_v29  ;;  %v831_v28 = vld [vmem:[%s1038_s4 + $0x1] ss:$0 sm:$0xff] }
  0x8a   : > { %v276_v53 = vmul.f32 5.0, %v269_v45 }
  0x8b   : > { %v281_v32 = vmul.f32 20.0, %v274_v30  ;;  %v279_v33 = vmul.f32 20.0, %v272_v31 }
  0x8c   : > { %v251_v34 = vpop.xlane.xlu1 %250  ;;  %v247_v35 = vpop.xlane.xlu0 %246  ;;  %v283_v59 = vmul.f32 20.0, %v276_v53 }
  0x8d   : > { %v261_v37 = vmul.f32 0.95, %v251_v34  ;;  %v259_v38 = vmul.f32 0.95, %v247_v35  ;;  %v255_v39 = vpop.xlane.xlu2 %254  ;;  %v687_v41 = vadd.f32 -1.0, %v281_v32  ;;  %v685_v44 = vadd.f32 -1.0, %v279_v33 }
  0x8e   : > { %v263_v40 = vmul.f32 0.95, %v255_v39  ;;  %v689_v62 = vadd.f32 -1.0, %v283_v59  ;;  %v808_v59 = vld [vmem:[%s1037_s3 + $0x10] sm:$0xff] }
  0x8f   : > { %v268_v42 = vsub.f32 %v231_v8, %v261_v37  ;;  %v266_v43 = vsub.f32 %v229_v9, %v259_v38  ;;  %v295_v49 = vmul.f32 100.0, %v687_v41  ;;  %v293_v52 = vmul.f32 100.0, %v685_v44  ;;  %v813_v44 = vld [vmem:[%s1037_s3 + $0x38] sm:$0xff] }
  0x90   : > { %v270_v48 = vsub.f32 %v939_v10, %v263_v40  ;;  %v297_v5 = vmul.f32 100.0, %v689_v62  ;;  %v805_v10 = vld [vmem:[%s1036_s2 + $0x38] sm:$0xff]  ;;  %587 = vmatpush.bf16.msra.mxu2 %v813_v44 }
  0x91   : > { %v275_v46 = vmul.f32 5.0, %v268_v42  ;;  %v273_v47 = vmul.f32 5.0, %v266_v43  ;;  %834 = vtanh.f32 %v295_v49  ;;  %482 = vmatpush.bf16.msra.mxu1 %v805_v10  ;;  %v811_v49 = vld [vmem:[%s1037_s3 + $0x28] sm:$0xff] }
  0x92   : > { %v277_v56 = vmul.f32 5.0, %v270_v48  ;;  %836 = vtanh.f32 %v293_v52 }
  0x93   : > { %v282_v50 = vmul.f32 20.0, %v275_v46  ;;  %v280_v51 = vmul.f32 20.0, %v273_v47  ;;  %v812_v47 = vld [vmem:[%s1037_s3 + $0x30] sm:$0xff] }
  0x94   : > { %v284_v60 = vmul.f32 20.0, %v277_v56  ;;  %v257_v61 = vpop.xlane.xlu0 %256  ;;  %588 = vmatpush.bf16.msra.mxu2 %v812_v47 }
  0x95   : > { %v688_v54 = vadd.f32 -1.0, %v282_v50  ;;  %v686_v55 = vadd.f32 -1.0, %v280_v51  ;;  %v264_v1 = vmul.f32 0.95, %v257_v61  ;;  %483 = vmatpush.bf16.msra.mxu1 %v804_v11  ;;  %v806_v61 = vld [vmem:[%s1037_s3] sm:$0xff] }
  0x96   : > { %v690_v0 = vadd.f32 -1.0, %v284_v60  ;;  %v807_v60 = vld [vmem:[%s1037_s3 + $0x8] sm:$0xff] }
  0x97   : > { %v296_v57 = vmul.f32 100.0, %v688_v54  ;;  %v294_v58 = vmul.f32 100.0, %v686_v55  ;;  %v835_v63 = vpop.eup %834  ;;  %v271_v9 = vsub.f32 %v942_v14, %v264_v1 }
  0x98   : > { %v837_v2 = vpop.eup %836  ;;  %v298_v7 = vmul.f32 100.0, %v690_v0  ;;  %589 = vmatpush.bf16.msra.mxu2 %v811_v49 }
  0x99   : > { %838 = vtanh.f32 %v296_v57  ;;  %v278_v12 = vmul.f32 5.0, %v271_v9  ;;  %484 = vmatpush.bf16.msra.mxu1 %v803_v13  ;;  %v810_v57 = vld [vmem:[%s1037_s3 + $0x20] sm:$0xff] }
  0x9a   : > { %840 = vtanh.f32 %v294_v58  ;;  %v809_v58 = vld [vmem:[%s1037_s3 + $0x18] sm:$0xff] }
  0x9b   : > { %842 = vtanh.f32 %v297_v5  ;;  %v285_v14 = vmul.f32 20.0, %v278_v12 }
  0x9c   : > { %844 = vtanh.f32 %v298_v7  ;;  %590 = vmatpush.bf16.msra.mxu2 %v810_v57 }
  0x9d   : > { %v691_v17 = vadd.f32 -1.0, %v285_v14  ;;  %485 = vmatpush.bf16.msra.mxu1 %v802_v22 }
  0x9f   : > { %v839_v3 = vpop.eup %838  ;;  %v299_v19 = vmul.f32 100.0, %v691_v17 }
  0xa0   : > { %v841_v4 = vpop.eup %840  ;;  %v308_v6 = vpack.c.bf16 %v839_v3, %v835_v63  ;;  %591 = vmatpush.bf16.msra.mxu2 %v809_v58  ;;  %v832_v63 = vld [vmem:[%s1038_s4 + $0x2] ss:$0 sm:$0xff] }
  0xa1   : > { %v307_v8 = vpack.c.bf16 %v841_v4, %v837_v2  ;;  %v843_v15 = vpop.eup %842  ;;  %846 = vtanh.f32 %v299_v19  ;;  %486 = vmatpush.bf16.msra.mxu1 %v801_v23 }
  0xa2   : > { %390 = vmatmul.bf16.vlgmr.msra.gmra.mxu3 %v308_v6  ;;  %v845_v16 = vpop.eup %844 }
  0xa3   : > { %385 = vmatmul.bf16.vlgmr.msra.gmra.mxu0 %v307_v8  ;;  %v309_v18 = vpack.c.bf16 %v845_v16, %v843_v15 }
  0xa4   : > { %592 = vmatpush.bf16.msra.mxu2 %v808_v59 }
  0xa5   : > { %487 = vmatpush.bf16.msra.mxu1 %v800_v24 }
  0xa7   : > { %v847_v20 = vpop.eup %846 }
  0xa8   : > { %v310_v21 = vpack.c.bf16 %v847_v20, %v847_v20  ;;  %593 = vmatpush.bf16.msra.mxu2 %v807_v60 }
  0xa9   : > { %488 = vmatpush.bf16.msra.mxu1 %v799_v25  ;;  %v833_v25 = vld [vmem:[%s1038_s4 + $0x3] ss:$0 sm:$0xff] }
  0xac   : > { %594 = vmatpush.bf16.msra.mxu2 %v806_v61 }
  0xad   : > { %489 = vmatpush.bf16.msra.mxu1 %v798_v26 }
  0xb2   : > { %395 = vmatmul.bf16.gmra.mxu3 %v309_v18 }
  0xc2   : > { %400 = vmatmul.bf16.gmra.mxu3 %v310_v21 }
 0x120   : > { %v386_v27 = vpop.f32.mrf.mxu0 }
 0x121   : > { %v387_v30 = vadd.f32 %v831_v28, %v386_v27 }
 0x123   : > { %848 = vtanh.f32 %v387_v30 }
 0x125   : > { %v391_v29 = vpop.f32.mrf.mxu3 }
 0x126   : > { %v392_v39 = vadd.f32 %v831_v28, %v391_v29 }
 0x128   : > { %v388_v31 = vpop.f32.mrf.mxu0 }
 0x129   : > { %v389_v32 = vadd.f32 %v831_v28, %v388_v31  ;;  %v849_v34 = vpop.eup %848 }
 0x12b   : > { %850 = vtanh.f32 %v389_v32 }
 0x12d   : > { %v393_v33 = vpop.f32.mrf.mxu3 }
 0x12e   : > { %v394_v37 = vadd.f32 %v831_v28, %v393_v33 }
 0x130   : > { %852 = vtanh.f32 %v394_v37 }
 0x131   : > { %v851_v35 = vpop.eup %850  ;;  %854 = vtanh.f32 %v392_v39 }
 0x132   : > { %v412_v36 = vpack.c.bf16 %v851_v35, %v849_v34 }
 0x134   : > { %490 = vmatmul.bf16.vlgmr.msra.gmra.mxu1 %v412_v36 }
 0x135   : > { %v396_v38 = vpop.f32.mrf.mxu3 }
 0x136   : > { %v853_v41 = vpop.eup %852  ;;  %v397_v48 = vadd.f32 %v831_v28, %v396_v38 }
 0x137   : > { %v855_v42 = vpop.eup %854 }
 0x138   : > { %v413_v43 = vpack.c.bf16 %v853_v41, %v855_v42 }
 0x13d   : > { %v398_v40 = vpop.f32.mrf.mxu3 }
 0x13e   : > { %v399_v45 = vadd.f32 %v831_v28, %v398_v40 }
 0x140   : > { %856 = vtanh.f32 %v399_v45 }
 0x141   : > { %858 = vtanh.f32 %v397_v48 }
 0x144   : > { %495 = vmatmul.bf16.gmra.mxu1 %v413_v43 }
 0x145   : > { %v401_v46 = vpop.f32.mrf.mxu3 }
 0x146   : > { %v857_v51 = vpop.eup %856  ;;  %v402_v54 = vadd.f32 %v831_v28, %v401_v46 }
 0x147   : > { %v859_v52 = vpop.eup %858 }
 0x148   : > { %v414_v53 = vpack.c.bf16 %v857_v51, %v859_v52  ;;  %860 = vtanh.f32 %v402_v54 }
 0x14d   : > { %v403_v50 = vpop.f32.mrf.mxu3 }
 0x14e   : > { %v861_v55 = vpop.eup %860 }
 0x14f   : > { %v415_v56 = vpack.c.bf16 %v861_v55, %v861_v55 }
 0x154   : > { %500 = vmatmul.bf16.gmra.mxu1 %v414_v53 }
 0x164   : > { %505 = vmatmul.bf16.gmra.mxu1 %v415_v56 }
 0x1b1   : > { %v491_v62 = vpop.f32.mrf.mxu1 }
 0x1b2   : > { %v492_v0 = vadd.f32 %v832_v63, %v491_v62 }
 0x1b4   : > { %862 = vtanh.f32 %v492_v0 }
 0x1b9   : > { %v493_v1 = vpop.f32.mrf.mxu1 }
 0x1ba   : > { %v494_v2 = vadd.f32 %v832_v63, %v493_v1  ;;  %v863_v3 = vpop.eup %862 }
 0x1bc   : > { %864 = vtanh.f32 %v494_v2 }
 0x1c1   : > { %v496_v4 = vpop.f32.mrf.mxu1 }
 0x1c2   : > { %v865_v5 = vpop.eup %864  ;;  %v497_v7 = vadd.f32 %v832_v63, %v496_v4 }
 0x1c3   : > { %v517_v6 = vpack.c.bf16 %v865_v5, %v863_v3 }
 0x1c4   : > { %866 = vtanh.f32 %v497_v7 }
 0x1c5   : > { %595 = vmatmul.bf16.vlgmr.msra.gmra.mxu2 %v517_v6 }
 0x1c9   : > { %v498_v8 = vpop.f32.mrf.mxu1 }
 0x1ca   : > { %v499_v9 = vadd.f32 %v832_v63, %v498_v8  ;;  %v867_v10 = vpop.eup %866 }
 0x1cc   : > { %868 = vtanh.f32 %v499_v9 }
 0x1d1   : > { %v501_v11 = vpop.f32.mrf.mxu1 }
 0x1d2   : > { %v869_v12 = vpop.eup %868  ;;  %v502_v14 = vadd.f32 %v832_v63, %v501_v11 }
 0x1d3   : > { %v518_v13 = vpack.c.bf16 %v869_v12, %v867_v10 }
 0x1d4   : > { %870 = vtanh.f32 %v502_v14 }
 0x1d5   : > { %600 = vmatmul.bf16.gmra.mxu2 %v518_v13 }
 0x1d9   : > { %v503_v15 = vpop.f32.mrf.mxu1 }
 0x1da   : > { %v504_v16 = vadd.f32 %v832_v63, %v503_v15  ;;  %v871_v17 = vpop.eup %870 }
 0x1dc   : > { %872 = vtanh.f32 %v504_v16 }
 0x1e1   : > { %v506_v18 = vpop.f32.mrf.mxu1 }
 0x1e2   : > { %v873_v19 = vpop.eup %872  ;;  %v507_v21 = vadd.f32 %v832_v63, %v506_v18 }
 0x1e3   : > { %v519_v20 = vpack.c.bf16 %v873_v19, %v871_v17 }
 0x1e4   : > { %874 = vtanh.f32 %v507_v21 }
 0x1e5   : > { %605 = vmatmul.bf16.gmra.mxu2 %v519_v20 }
 0x1e9   : > { %v508_v22 = vpop.f32.mrf.mxu1 }
 0x1ea   : > { %v875_v23 = vpop.eup %874 }
 0x1eb   : > { %v520_v24 = vpack.c.bf16 %v875_v23, %v875_v23 }
 0x1f5   : > { %610 = vmatmul.bf16.gmra.mxu2 %v520_v24 }
 0x248   : > { %v596_v26 = vpop.f32.mrf.mxu2 }
 0x249   : > { %v597_v27 = vadd.f32 %v833_v25, %v596_v26 }
 0x24b   : > { %615 = vst [vmem:[%s226_s14] sm:$0xff] %v597_v27 }
 0x250   : > { %v598_v28 = vpop.f32.mrf.mxu2 }
 0x251   : > { %v599_v29 = vadd.f32 %v833_v25, %v598_v28 }
 0x253   : > { %616 = vst [vmem:[%s226_s14 + $0x8] sm:$0xff] %v599_v29 }
 0x258   : > { %v601_v30 = vpop.f32.mrf.mxu2 }
 0x259   : > { %v602_v31 = vadd.f32 %v833_v25, %v601_v30 }
 0x25b   : > { %617 = vst [vmem:[%s226_s14 + $0x10] sm:$0xff] %v602_v31 }
 0x260   : > { %v603_v32 = vpop.f32.mrf.mxu2 }
 0x261   : > { %v604_v33 = vadd.f32 %v833_v25, %v603_v32 }
 0x263   : > { %618 = vst [vmem:[%s226_s14 + $0x18] sm:$0xff] %v604_v33 }
 0x268   : > { %v606_v34 = vpop.f32.mrf.mxu2 }
 0x269   : > { %v607_v35 = vadd.f32 %v833_v25, %v606_v34 }
 0x26b   : > { %619 = vst [vmem:[%s226_s14 + $0x20] sm:$0xff] %v607_v35 }
 0x270   : > { %v608_v36 = vpop.f32.mrf.mxu2 }
 0x271   : > { %v609_v37 = vadd.f32 %v833_v25, %v608_v36 }
 0x273   : > { %620 = vst [vmem:[%s226_s14 + $0x28] sm:$0xff] %v609_v37 }
 0x278   : > { %v611_v38 = vpop.f32.mrf.mxu2 }
 0x279   : > { %v612_v39 = vadd.f32 %v833_v25, %v611_v38 }
 0x27b   : > { %621 = vst [vmem:[%s226_s14 + $0x30] sm:$0xff] %v612_v39 }
 0x280   : > { %v613_v40 = vpop.f32.mrf.mxu2 }
 0x281 PF: > { %s15_s18 = sadd.s32 1, %s882_s18  }
 0x282   : > { %p12_p4 = scmp.ge.s32.totalorder %s15_s18, 4  }
 0x284   :  { %14 = sbr.rel (!%p12_p4) target bundleno = 1 (0x1), region = 70 }

</bundles_post_ra>
